<compile_context>
chip_gen: v6e
topology: v6e:2x2x1
jax: 0.10.0
libtpu: 0.0.40
codegen_flags: <defaults>
</compile_context>

<pallas_src>
import functools

import jax
import jax.numpy as jnp
from jax.experimental import pallas as pl
from jax.experimental.pallas import tpu as pltpu

LANE = 128          # output channels padded to this (lane-dense stores, full MXU width)
MAX_K_BLOCK = 2048  # max contraction-dim block; bounds VMEM working set (v7x: 64 MiB)


def _round_up(x, m):
    return ((x + m - 1) // m) * m


# ---------------------------------------------------------------------------
# Pallas kernel: fused  (patches @ W') + bias [+ residual] [+ ReLU]
#   W' already has the BatchNorm scale folded in, so the kernel is a pure MXU
#   matmul (bf16 in, f32 accumulate) plus a small VPU epilogue.
# ---------------------------------------------------------------------------
def _conv_bn_kernel(*refs, apply_relu, has_residual, single_k):
    if single_k:
        if has_residual:
            p_ref, w_ref, b_ref, r_ref, o_ref = refs
        else:
            (p_ref, w_ref, b_ref, o_ref), r_ref = refs, None
        y = jnp.dot(p_ref[...], w_ref[...], preferred_element_type=jnp.float32)
        y = y + b_ref[...]
        if r_ref is not None:
            y = y + r_ref[...]
        if apply_relu:
            y = jnp.maximum(y, 0.0)
        o_ref[...] = y.astype(o_ref.dtype)
        return

    # K-blocked path: accumulate over the "arbitrary" reduction axis.
    if has_residual:
        p_ref, w_ref, b_ref, r_ref, o_ref, acc_ref = refs
    else:
        (p_ref, w_ref, b_ref, o_ref, acc_ref), r_ref = refs, None
    k = pl.program_id(1)

    @pl.when(k == 0)
    def _():
        acc_ref[...] = jnp.zeros_like(acc_ref)

    acc_ref[...] += jnp.dot(p_ref[...], w_ref[...], preferred_element_type=jnp.float32)

    @pl.when(k == pl.num_programs(1) - 1)
    def _():
        y = acc_ref[...] + b_ref[...]
        if r_ref is not None:
            y = y + r_ref[...]
        if apply_relu:
            y = jnp.maximum(y, 0.0)
        o_ref[...] = y.astype(o_ref.dtype)


def conv_bn_gemm(patches, w, scale, bias, residual=None, *, apply_relu,
                 tm=512, out_dtype=jnp.float32, keep_padded_cout=False):
    """Fused conv-as-GEMM + folded BN + optional residual + optional ReLU.

    patches : [M, K]    im2col patch matrix (cast to bf16 for the MXU)
    w       : [K, Cout] GEMM weight (f32)
    scale   : [Cout]    BN scale  (folded into w at trace time)
    bias    : [Cout]    BN bias   (added in the kernel epilogue)
    residual: [M, Cout] or [M, Cout_padded] f32, or None
    Returns [M, Cout] (or [M, Cout_padded] if keep_padded_cout) in out_dtype.
    """
    M, K = patches.shape
    Cout = w.shape[1]
    Coutp = _round_up(Cout, LANE)

    # Fold BN scale into the weight; pad channels to a lane multiple with zeros
    # (padded columns produce exact zeros -> safe to slice off afterwards).
    w_scaled = w.astype(jnp.float32) * scale.astype(jnp.float32)[None, :]
    bias = bias.astype(jnp.float32)
    if Coutp != Cout:
        w_scaled = jnp.pad(w_scaled, ((0, 0), (0, Coutp - Cout)))
        bias = jnp.pad(bias, (0, Coutp - Cout))
    bias2 = bias.reshape(1, Coutp)

    # Contraction-dim blocking only when K is large (bounds the VMEM working set).
    if K > MAX_K_BLOCK:
        k_units = pl.cdiv(K, LANE)
        nk = pl.cdiv(k_units * LANE, MAX_K_BLOCK)
        tk = pl.cdiv(k_units, nk) * LANE
        Kp = nk * tk
    else:
        Kp, tk, nk = K, K, 1

    # M tiling: single tile when small (no row padding / no out[:M] copy).
    tm = min(tm, _round_up(M, 8))
    Mp = _round_up(M, tm)

    patches = patches.astype(jnp.bfloat16)
    if Kp != K or Mp != M:
        patches = jnp.pad(patches, ((0, Mp - M), (0, Kp - K)))
    if Kp != K:
        w_scaled = jnp.pad(w_scaled, ((0, Kp - K), (0, 0)))
    w_bf = w_scaled.astype(jnp.bfloat16)

    has_residual = residual is not None
    if has_residual:
        residual = residual.astype(jnp.float32)
        pc = Coutp - residual.shape[1]
        if pc or Mp != M:
            residual = jnp.pad(residual, ((0, Mp - M), (0, pc)))

    in_specs = [
        pl.BlockSpec((tm, tk), lambda i, k: (i, k)),       # patch tile
        pl.BlockSpec((tk, Coutp), lambda i, k: (k, 0)),    # weight K-slab (scale folded)
        pl.BlockSpec((1, Coutp), lambda i, k: (0, 0)),     # folded BN bias
    ]
    args = [patches, w_bf, bias2]
    if has_residual:
        in_specs.append(pl.BlockSpec((tm, Coutp), lambda i, k: (i, 0)))
        args.append(residual)

    itemsize_out = jnp.dtype(out_dtype).itemsize
    bytes_accessed = (Mp * Kp * 2                       # bf16 patches
                      + (Mp // tm) * Kp * Coutp * 2     # bf16 weight per M tile
                      + Coutp * 4                       # bias
                      + Mp * Coutp * itemsize_out       # output
                      + (Mp * Coutp * 4 if has_residual else 0))
    cost = pl.CostEstimate(flops=2 * Mp * Kp * Coutp, transcendentals=0,
                           bytes_accessed=bytes_accessed)

    out = pl.pallas_call(
        functools.partial(_conv_bn_kernel, apply_relu=apply_relu,
                          has_residual=has_residual, single_k=(nk == 1)),
        out_shape=jax.ShapeDtypeStruct((Mp, Coutp), out_dtype),
        grid=(Mp // tm, nk),
        in_specs=in_specs,
        out_specs=pl.BlockSpec((tm, Coutp), lambda i, k: (i, 0)),
        scratch_shapes=([] if nk == 1 else [pltpu.VMEM((tm, Coutp), jnp.float32)]),
        compiler_params=pltpu.CompilerParams(
            # M axis shards across TensorCores (v7x megacore); K axis is a reduction.
            dimension_semantics=("parallel", "arbitrary"),
            vmem_limit_bytes=48 * 1024 * 1024),
        cost_estimate=cost,
    )(*args)

    if Mp != M:
        out = out[:M]
    if not keep_padded_cout and Coutp != Cout:
        out = out[:, :Cout]
    return out


# ---------------------------------------------------------------------------
# Glue: im2col patch extraction, BN folding, weight layout, parameter setup
# ---------------------------------------------------------------------------
def _im2col(x_nhwc, k, stride, pad):
    """x: [N, H, W, C] -> patches [N*Ho*Wo, k*k*C], ordered (kh, kw, cin)."""
    N, H, W, C = x_nhwc.shape
    xp = jnp.pad(x_nhwc, ((0, 0), (pad, pad), (pad, pad), (0, 0)))
    Ho = (H + 2 * pad - k) // stride + 1
    Wo = (W + 2 * pad - k) // stride + 1
    cols = []
    for di in range(k):
        for dj in range(k):
            cols.append(xp[:,
                           di:di + stride * (Ho - 1) + 1:stride,
                           dj:dj + stride * (Wo - 1) + 1:stride, :])
    patches = jnp.concatenate(cols, axis=-1)  # [N, Ho, Wo, k*k*C]
    return patches.reshape(N * Ho * Wo, k * k * C), (N, Ho, Wo)


def _bn_fold(gamma, beta, mean, var, eps=1e-5):
    scale = gamma / jnp.sqrt(var + eps)
    return scale, beta - mean * scale


def _conv_w_to_gemm(w_oihw):
    """PyTorch OIHW conv weight -> [kh*kw*Cin, Cout] matching _im2col ordering."""
    return jnp.transpose(w_oihw, (2, 3, 1, 0)).reshape(-1, w_oihw.shape[0])


def init_residual_block_params(key, in_channels, out_channels, stride):
    ks = jax.random.split(key, 12)

    def bn(k1, k2, k3, k4, c):
        gamma = jax.random.normal(k1, (c,), jnp.float32) * 0.1 + 1.0
        beta = jax.random.normal(k2, (c,), jnp.float32) * 0.1
        mean = jax.random.normal(k3, (c,), jnp.float32) * 0.1
        var = jax.random.uniform(k4, (c,), jnp.float32, 0.5, 1.5)
        return (gamma, beta, mean, var)

    params = {
        "w1": jax.random.normal(ks[0], (out_channels, in_channels, 3, 3), jnp.float32) * 0.1,
        "bn1": bn(ks[1], ks[2], ks[3], ks[4], out_channels),
        "w2": jax.random.normal(ks[5], (out_channels, out_channels, 3, 3), jnp.float32) * 0.1,
        "bn2": bn(ks[6], ks[7], ks[8], ks[9], out_channels),
    }
    if stride != 1 or in_channels != out_channels:
        params["w_sc"] = jax.random.normal(ks[10], (out_channels, in_channels, 1, 1), jnp.float32) * 0.1
        params["bn_sc"] = bn(*jax.random.split(ks[11], 4), out_channels)
    return params


def residual_block_forward(x_nchw, params, stride):
    x = jnp.transpose(x_nchw, (0, 2, 3, 1)).astype(jnp.float32)  # NHWC
    N, H, W, Cin = x.shape
    Cout = params["w1"].shape[0]

    # Patch expansion in bf16: im2col is the dominant HBM cost, halve its bytes.
    x_bf = x.astype(jnp.bfloat16)

    # ---- conv1 + bn1 + relu (no residual stream) ----
    p1, (Nn, Ho, Wo) = _im2col(x_bf, 3, stride, 1)
    w1 = _conv_w_to_gemm(params["w1"])
    s1, b1 = _bn_fold(*params["bn1"])
    h = conv_bn_gemm(p1, w1, s1, b1, None, apply_relu=True,
                     out_dtype=jnp.bfloat16)                       # [M, Cout] bf16

    M = Nn * Ho * Wo

    # ---- shortcut branch (kept channel-padded to avoid a pad round-trip) ----
    if "w_sc" in params:
        xs = x_bf[:, ::stride, ::stride, :]
        sc_patches = xs.reshape(M, Cin)
        w_sc = _conv_w_to_gemm(params["w_sc"])
        s_sc, b_sc = _bn_fold(*params["bn_sc"])
        shortcut = conv_bn_gemm(sc_patches, w_sc, s_sc, b_sc, None,
                                apply_relu=False, out_dtype=jnp.float32,
                                keep_padded_cout=True)             # [M, Coutp] f32
    else:
        shortcut = x.reshape(M, Cin)  # identity (Cin == Cout, stride == 1), f32

    # ---- conv2 + bn2 + shortcut + relu (residual fused into the kernel) ----
    h_img = h.reshape(Nn, Ho, Wo, Cout)
    p2, _ = _im2col(h_img, 3, 1, 1)
    w2 = _conv_w_to_gemm(params["w2"])
    s2, b2 = _bn_fold(*params["bn2"])
    out = conv_bn_gemm(p2, w2, s2, b2, shortcut, apply_relu=True,
                       out_dtype=jnp.float32)                      # [M, Cout]

    out = out.reshape(Nn, Ho, Wo, Cout)
    return jnp.transpose(out, (0, 3, 1, 2))  # back to NCHW


# ---------------------------------------------------------------------------
# Pure-JAX reference (lax.conv, f32) for correctness check
# ---------------------------------------------------------------------------
def _reference_forward(x_nchw, params, stride):
    dn = ("NCHW", "OIHW", "NCHW")

    def conv(x, w, s, pad):
        return jax.lax.conv_general_dilated(
            x, w, window_strides=(s, s), padding=((pad, pad), (pad, pad)),
            dimension_numbers=dn)

    def bn(x, p):
        gamma, beta, mean, var = p
        scale = gamma / jnp.sqrt(var + 1e-5)
        shift = beta - mean * scale
        return x * scale[None, :, None, None] + shift[None, :, None, None]

    h = jax.nn.relu(bn(conv(x_nchw, params["w1"], stride, 1), params["bn1"]))
    h = bn(conv(h, params["w2"], 1, 1), params["bn2"])
    if "w_sc" in params:
        sc = bn(conv(x_nchw, params["w_sc"], stride, 0), params["bn_sc"])
    else:
        sc = x_nchw
    return jax.nn.relu(h + sc)


if __name__ == "__main__":
    key = jax.random.PRNGKey(0)
    k_x, k_p = jax.random.split(key)

    N, Cin, H, W = 2, 4, 16, 16
    Cout, stride = 8, 2

    x = jax.random.normal(k_x, (N, Cin, H, W), jnp.float32)
    params = init_residual_block_params(k_p, Cin, Cout, stride)

    out = residual_block_forward(x, params, stride)
    out = jax.block_until_ready(out)

    ref = jax.block_until_ready(_reference_forward(x, params, stride))
    assert out.shape == ref.shape == (N, Cout, H // stride, W // stride)
    # Tolerance accounts for bf16 MXU operands (f32 accumulation) vs. f32 reference.
    assert jnp.allclose(out, ref, atol=5e-2, rtol=5e-2), "mismatch vs lax.conv reference"

    print("KERNEL_OK")
</pallas_src>

<mosaic_0001>
module attributes {stable_mosaic.version = 11 : i64} {
  func.func @_conv_bn_kernel(%arg0: i32, %arg1: i32, %arg2: memref<128x36xbf16, #tpu.memory_space<vmem>>, %arg3: memref<36x128xbf16, #tpu.memory_space<vmem>>, %arg4: memref<1x128xf32, #tpu.memory_space<vmem>>, %arg5: memref<128x128xbf16, #tpu.memory_space<vmem>>) attributes {dimension_semantics = [#tpu.dimension_semantics<parallel>, #tpu.dimension_semantics<arbitrary>], iteration_bounds = array<i64: 1, 1>, scalar_prefetch = 0 : i64, scratch_operands = 0 : i64, tpu.core_type = #tpu.core_type<tc>, window_params = [{transform_indices = @transform_0, window_bounds = array<i64: 128, 36>}, {transform_indices = @transform_1, window_bounds = array<i64: 36, 128>}, {pipeline_mode = #tpu.pipeline_mode<synchronous>, transform_indices = @transform_2, window_bounds = array<i64: 1, 128>}, {transform_indices = @transform_3, window_bounds = array<i64: 128, 128>}]} {
    %c0 = arith.constant 0 : index
    %c0_0 = arith.constant 0 : index
    %0 = vector.load %arg2[%c0, %c0_0] : memref<128x36xbf16, #tpu.memory_space<vmem>>, vector<128x36xbf16>
    %c0_1 = arith.constant 0 : index
    %c0_2 = arith.constant 0 : index
    %1 = vector.load %arg3[%c0_1, %c0_2] : memref<36x128xbf16, #tpu.memory_space<vmem>>, vector<36x128xbf16>
    %cst = arith.constant dense<0.000000e+00> : vector<128x128xf32>
    %2 = tpu.matmul %0, %1, %cst {dimension_numbers = #tpu.dot_dimension_numbers<[1], [0], [0], [1], [0, 0, 1, 1], [], []>} : vector<128x36xbf16>, vector<36x128xbf16>, vector<128x128xf32> -> vector<128x128xf32>
    %c0_3 = arith.constant 0 : index
    %c0_4 = arith.constant 0 : index
    %3 = vector.load %arg4[%c0_3, %c0_4] : memref<1x128xf32, #tpu.memory_space<vmem>>, vector<1x128xf32>
    %4 = vector.broadcast %3 : vector<1x128xf32> to vector<128x128xf32>
    %5 = arith.addf %2, %4 : vector<128x128xf32>
    %cst_5 = arith.constant 0.000000e+00 : f32
    %6 = vector.broadcast %cst_5 : f32 to vector<128x128xf32>
    %7 = arith.maximumf %5, %6 : vector<128x128xf32>
    %8 = arith.truncf %7 : vector<128x128xf32> to vector<128x128xbf16>
    %c0_6 = arith.constant 0 : index
    %c0_7 = arith.constant 0 : index
    %9 = vector.load %arg5[%c0_6, %c0_7] : memref<128x128xbf16, #tpu.memory_space<vmem>>, vector<128x128xbf16>
    tpu.vector_store %arg5[%c0_6, %c0_7], %8 {strides = array<i32>} : memref<128x128xbf16, #tpu.memory_space<vmem>>, vector<128x128xbf16>,
    return
  }
  func.func @transform_0(%arg0: i32, %arg1: i32) -> (i32, i32) {
    %c0_i32 = arith.constant 0 : i32
    return %arg0, %arg1 : i32, i32
  }
  func.func @transform_1(%arg0: i32, %arg1: i32) -> (i32, i32) {
    %c0_i32 = arith.constant 0 : i32
    %c0_i32_0 = arith.constant 0 : i32
    return %arg1, %c0_i32 : i32, i32
  }
  func.func @transform_2(%arg0: i32, %arg1: i32) -> (i32, i32) {
    %c0_i32 = arith.constant 0 : i32
    %c0_i32_0 = arith.constant 0 : i32
    %c0_i32_1 = arith.constant 0 : i32
    return %c0_i32, %c0_i32_0 : i32, i32
  }
  func.func @transform_3(%arg0: i32, %arg1: i32) -> (i32, i32) {
    %c0_i32 = arith.constant 0 : i32
    %c0_i32_0 = arith.constant 0 : i32
    return %arg0, %c0_i32 : i32, i32
  }
}

</mosaic_0001>

<bundles_post_ra>
// kernel: tpu_custom_call.1
= control target key start
LH: loop header
LB: loop body
LE: loop exit
PB: predicated region body
PF: predicated region fallthrough
CT: control target
= control target key end

     0   :  { %vm124_vm0 = vcmask 1041408   ;;  %vm99_vm1 = vcmask 293888   ;;  %s583_s0 = inlined_call_operand.vmem [shape: bf16[128,36], index: 0, kind: input, shape index: {}]   ;;  %s584_s1 = inlined_call_operand.vmem [shape: bf16[36,128], index: 1, kind: input, shape index: {}]   ;;  %s585_s2 = inlined_call_operand.vmem [shape: f32[1,128], index: 2, kind: input, shape index: {}]   ;;  %s586_s3 = inlined_call_operand.hbm [shape: bf16[128,128], index: 3, kind: output, shape index: {}]  }
   0x1   :  { %v480_v0 = vld [vmem:[%s584_s1 + $0x10] ss:$0 sps:$4 sm:$0x33]   ;;  %v481_v1 = vld [vmem:[%s584_s1 + $0x8] sm:$0xff]   ;;  %v482_v3 = vld [vmem:[%s584_s1] sm:$0xff]  }
   0x2   :  { %475 = vmatprep.subr.msk.bf16.mxu0 %vm124_vm0, %v480_v0  ;;  %476 = vmatprep.subr.msk.bf16.mxu1 %vm124_vm0, %v480_v0  ;;  %v126_v2 = vsel %vm124_vm0, %v480_v0, 0  ;;  %v483_v4 = vld [vmem:[%s583_s0] sm:$0xff]   ;;  %v485_v6 = vld [vmem:[%s583_s0 + $0x8] sm:$0xff]   ;;  %v487_v8 = vld [vmem:[%s583_s0 + $0x10] sm:$0xff]  }
   0x3   :  { %448 = vmatpush3.bf16.msra.mxu0 %v126_v2  ;;  %472 = vmatpush3.bf16.msra.mxu1 %v126_v2  ;;  %v484_v5 = vld [vmem:[%s583_s0 + $0x20] sm:$0xff]   ;;  %v486_v7 = vld [vmem:[%s583_s0 + $0x28] sm:$0xff]   ;;  %v488_v9 = vld [vmem:[%s583_s0 + $0x30] sm:$0xff]  }
   0x4   :  { %449 = vmatprep.subr.bf16.mxu0 %v481_v1  ;;  %470 = vmatprep.subr.bf16.mxu1 %v481_v1 }
   0x5   :  { %453 = vmatprep.mubr.msk.bf16.mxu0 %vm99_vm1, %v483_v4  ;;  %461 = vmatprep.mubr.msk.bf16.mxu1 %vm99_vm1, %v484_v5 }
   0x7   :  { %450 = vmatpush3.bf16.msra.mxu0 %v481_v1  ;;  %473 = vmatpush3.bf16.msra.mxu1 %v481_v1 }
   0x8   :  { %451 = vmatprep.subr.bf16.mxu0 %v482_v3  ;;  %471 = vmatprep.subr.bf16.mxu1 %v482_v3 }
   0xb   :  { %452 = vmatpush3.bf16.msra.mxu0 %v482_v3  ;;  %474 = vmatpush3.bf16.msra.mxu1 %v482_v3 }
   0xc   :  { %8 = vsyncpa [#allocation3], 0  ;;  %v489_v10 = vld [vmem:[%s583_s0 + $0x18] sm:$0xff]   ;;  %v337_v12 = vld [vmem:[%s585_s2] ss:$0 sm:$0xff] }
   0xd   :  { %v490_v11 = vld [vmem:[%s583_s0 + $0x38] sm:$0xff]   ;;  %s513_s0 = smov [#allocation2]  }
   0xe   :  { %454 = vmatmul.mubr.msk.bf16.vlgmr.msra.gmra.mxu0 %vm99_vm1, %v485_v6  ;;  %462 = vmatmul.mubr.msk.bf16.vlgmr.msra.gmra.mxu1 %vm99_vm1, %v486_v7  ;;  %s326_s2 = sshll.u32 %s513_s0, 4  ;;  %s327_s2 = int_to_ptr.vmem [resolvable:$true] %s326_s2 }
   0xf   :  { %457 = vmatprep.mubr.msk.bf16.mxu0 %vm99_vm1, %v487_v8  ;;  %465 = vmatprep.mubr.msk.bf16.mxu1 %vm99_vm1, %v488_v9  ;;  %s491_s8 = scalar_lea.vmem %s327_s2, 1024  ;;  %p496_p1 = scmp.lt.s32.totalorder %s327_s2, %s327_s2 }
  0x10   :  { %p492_p0 = scmp.ne.s32.totalorder %s327_s2, %s491_s8  ;;  %p497_p2 = scmp.lt.s32.totalorder %s491_s8, %s491_s8 }
  0x12   :  { %p498_p3 = por %p497_p2, %p496_p1 }
  0x14   :  { %p499_p4 = pnand %p498_p3, %p492_p0 }
  0x16   :  { %458 = vmatmul.mubr.msk.bf16.gmra.mxu0 %vm99_vm1, %v489_v10  ;;  %466 = vmatmul.mubr.msk.bf16.gmra.mxu1 %vm99_vm1, %v490_v11 }
  0xce   :  { %v455_v13 = vpop.f32.mrf.mxu0  ;;  %v463_v14 = vpop.f32.mrf.mxu1 }
  0xcf   :  { %v171_v15 = vadd.f32 %v455_v13, %v337_v12  ;;  %v203_v16 = vadd.f32 %v463_v14, %v337_v12 }
  0xd0   :  { %v162_v17 = vpop.f32.mrf.mxu0  ;;  %v194_v18 = vpop.f32.mrf.mxu1 }
  0xd1   :  { %v163_v19 = vadd.f32 %v337_v12, %v162_v17  ;;  %v195_v20 = vadd.f32 %v337_v12, %v194_v18  ;;  %v227_v25 = vmax.f32 %v171_v15, 0.0  ;;  %v235_v26 = vmax.f32 %v203_v16, 0.0 }
  0xd2   :  { %v456_v21 = vpop.f32.mrf.mxu0  ;;  %v464_v22 = vpop.f32.mrf.mxu1 }
  0xd3   :  { %v174_v23 = vadd.f32 %v456_v21, %v337_v12  ;;  %v206_v24 = vadd.f32 %v464_v22, %v337_v12  ;;  %v225_v33 = vmax.f32 %v163_v19, 0.0  ;;  %v233_v34 = vmax.f32 %v195_v20, 0.0 }
  0xd4   :  { %v165_v27 = vpop.f32.mrf.mxu0  ;;  %v197_v28 = vpop.f32.mrf.mxu1 }
  0xd5   :  { %v228_v29 = vmax.f32 %v174_v23, 0.0  ;;  %v236_v30 = vmax.f32 %v206_v24, 0.0  ;;  %v166_v31 = vadd.f32 %v337_v12, %v165_v27  ;;  %v198_v32 = vadd.f32 %v337_v12, %v197_v28 }
  0xd6   :  { %v459_v35 = vpop.f32.mrf.mxu0  ;;  %v467_v36 = vpop.f32.mrf.mxu1 }
  0xd7   :  { %v397_v37 = vpack.c.bf16 %v228_v29, %v227_v25  ;;  %v417_v38 = vpack.c.bf16 %v236_v30, %v235_v26  ;;  %v226_v39 = vmax.f32 %v166_v31, 0.0  ;;  %v234_v40 = vmax.f32 %v198_v32, 0.0 }
  0xd8   :  { %v187_v41 = vadd.f32 %v459_v35, %v337_v12  ;;  %v219_v42 = vadd.f32 %v467_v36, %v337_v12  ;;  %v178_v43 = vpop.f32.mrf.mxu0  ;;  %v210_v44 = vpop.f32.mrf.mxu1 }
  0xd9   :  { %429 = vst [vmem:[#allocation2 + $0x8] sm:$0xff] %v397_v37   ;;  %433 = vst [vmem:[#allocation2 + $0x28] sm:$0xff] %v417_v38   ;;  %v392_v45 = vpack.c.bf16 %v226_v39, %v225_v33  ;;  %v412_v46 = vpack.c.bf16 %v234_v40, %v233_v34  ;;  %v179_v47 = vadd.f32 %v337_v12, %v178_v43 }
  0xda   :  { %v211_v48 = vadd.f32 %v337_v12, %v210_v44  ;;  %v460_v49 = vpop.f32.mrf.mxu0  ;;  %v468_v50 = vpop.f32.mrf.mxu1  ;;  %v231_v53 = vmax.f32 %v187_v41, 0.0  ;;  %v239_v54 = vmax.f32 %v219_v42, 0.0 }
  0xdb   :  { %393 = vst [vmem:[#allocation2] sm:$0xff] %v392_v45   ;;  %432 = vst [vmem:[#allocation2 + $0x20] sm:$0xff] %v412_v46   ;;  %v190_v51 = vadd.f32 %v460_v49, %v337_v12  ;;  %v222_v52 = vadd.f32 %v468_v50, %v337_v12  ;;  %v229_v61 = vmax.f32 %v179_v47, 0.0 }
  0xdc   :  { %v181_v55 = vpop.f32.mrf.mxu0  ;;  %v213_v56 = vpop.f32.mrf.mxu1  ;;  %v237_v62 = vmax.f32 %v211_v48, 0.0 }
  0xdd   :  { %v232_v57 = vmax.f32 %v190_v51, 0.0  ;;  %v240_v58 = vmax.f32 %v222_v52, 0.0  ;;  %v182_v59 = vadd.f32 %v337_v12, %v181_v55  ;;  %v214_v60 = vadd.f32 %v337_v12, %v213_v56 }
  0xdf   :  { %v407_v63 = vpack.c.bf16 %v232_v57, %v231_v53  ;;  %v427_v0 = vpack.c.bf16 %v240_v58, %v239_v54  ;;  %v230_v1 = vmax.f32 %v182_v59, 0.0  ;;  %v238_v2 = vmax.f32 %v214_v60, 0.0 }
  0xe1   :  { %431 = vst [vmem:[#allocation2 + $0x18] sm:$0xff] %v407_v63   ;;  %435 = vst [vmem:[#allocation2 + $0x38] sm:$0xff] %v427_v0   ;;  %v402_v3 = vpack.c.bf16 %v230_v1, %v229_v61  ;;  %v422_v4 = vpack.c.bf16 %v238_v2, %v237_v62 }
  0xe3   :  { %430 = vst [vmem:[#allocation2 + $0x10] sm:$0xff] %v402_v3   ;;  %434 = vst [vmem:[#allocation2 + $0x30] sm:$0xff] %v422_v4  }
  0xe4   :  { %502 = shalt.err (!%p499_p4)
}
  0xe5   :  { %s514_s9 = smov 64   ;;  %s515_s10 = smov 4  }
  0xe6   :  { %332 = dma.vmem_to_hbm [thread:$0]  %s327_s2, 1024, %s586_s3, [#allocation3], %s514_s9, %s514_s9, %s515_s10  }
  0xe7   :  { %511 = dma.done.wait [#allocation3], 1024  }
  0xe8   :  { %512 = vsyncadd [#allocation3], 4294966272 }
  0xe9   :  { %336 = vsyncpa [#allocation3], 1 }

</bundles_post_ra>
